<compile_context>
chip_gen: v5e
topology: v5e:2x2
jax: 0.10.0
libtpu: 0.0.40
codegen_flags: <defaults>
</compile_context>

<pallas_src>
import jax
import jax.numpy as jnp
from jax.experimental import pallas as pl
from jax.experimental.pallas import tpu as pltpu

GROUP = 8          # batch rows packed per vreg row (8 * 16 lanes = 128)
PROJ = 16          # gaussian projection width
OUT_DIM = 32       # fc output width


def _round_up(a, b):
    return ((a + b - 1) // b) * b


def latency_encoder_kernel(x_ref, b_ref, ws_ref, wc_ref, bias_ref, out_ref):
    # x_ref [TBr,128], b_ref [1,128], ws/wc [128,256], bias [1,256], out [TBr,256]
    xp = x_ref[...] * b_ref[...]                 # 2*pi already folded into b
    s = jnp.sin(xp)                              # full 128-lane transcendentals
    c = jnp.cos(xp)
    out = (jnp.dot(s, ws_ref[...], preferred_element_type=jnp.float32)
           + jnp.dot(c, wc_ref[...], preferred_element_type=jnp.float32)
           + bias_ref[...])                      # [TBr, 256], lane-dense
    out_ref[...] = out.astype(out_ref.dtype)


def latency_encoder(x, B, W, bias, *, block_rows=256):
    """x: [bs,1] f32; B: [16] f32; W: [32,32] f32 (= fc.weight.T); bias: [32] f32."""
    bs = x.shape[0]
    in_dim, out_dim = W.shape
    assert in_dim == 2 * PROJ and out_dim == OUT_DIM

    # ---- host-side layout plumbing (pure XLA, cheap) ------------------------
    n_rows = -(-bs // GROUP)                       # packed rows needed
    tbr = min(block_rows, _round_up(n_rows, 8))    # packed rows per grid step
    n_rows_pad = _round_up(n_rows, tbr)            # pad so blocks divide exactly
    bs_pad = n_rows_pad * GROUP

    x_flat = jnp.pad(x.reshape(-1), (0, bs_pad - bs))
    # row r, lanes g*16+j  = x[8r+g]
    x_packed = jnp.repeat(x_flat.reshape(n_rows_pad, GROUP), PROJ, axis=1)

    # fold 2*pi into B; tile to 128 lanes (8 copies of the 16-wide vector)
    b_packed = jnp.tile((2.0 * jnp.pi) * B.reshape(-1), GROUP).reshape(1, GROUP * PROJ)
    # block-diagonal expansions of the two halves of W
    eye = jnp.eye(GROUP, dtype=W.dtype)
    ws_blk = jnp.kron(eye, W[:PROJ, :])            # [128, 256]
    wc_blk = jnp.kron(eye, W[PROJ:, :])            # [128, 256]
    bias_t = jnp.tile(bias.reshape(-1), GROUP).reshape(1, GROUP * out_dim)

    lanes_in = GROUP * PROJ        # 128
    lanes_out = GROUP * out_dim    # 256
    grid = (n_rows_pad // tbr,)

    out_slab = pl.pallas_call(
        latency_encoder_kernel,
        out_shape=jax.ShapeDtypeStruct((n_rows_pad, lanes_out), jnp.float32),
        grid_spec=pltpu.PrefetchScalarGridSpec(
            num_scalar_prefetch=0,
            grid=grid,
            in_specs=[
                pl.BlockSpec((tbr, lanes_in), lambda i: (i, 0)),        # x (tiled)
                pl.BlockSpec((1, lanes_in), lambda i: (0, 0)),          # B    (resident)
                pl.BlockSpec((lanes_in, lanes_out), lambda i: (0, 0)),  # Ws   (resident)
                pl.BlockSpec((lanes_in, lanes_out), lambda i: (0, 0)),  # Wc   (resident)
                pl.BlockSpec((1, lanes_out), lambda i: (0, 0)),         # bias (resident)
            ],
            out_specs=pl.BlockSpec((tbr, lanes_out), lambda i: (i, 0)),
        ),
        compiler_params=pltpu.CompilerParams(
            dimension_semantics=("parallel",)),   # independent tiles -> 2-TC on v7x
    )(x_packed, b_packed, ws_blk, wc_blk, bias_t)

    # un-pack: [R,256] -> [R*8, 32] -> [bs, 32]
    return out_slab.reshape(bs_pad, out_dim)[:bs]


def reference(x, B, W, bias):
    x_proj = 2.0 * jnp.pi * x * B.reshape(1, -1)
    feats = jnp.concatenate([jnp.sin(x_proj), jnp.cos(x_proj)], axis=-1)
    return feats @ W + bias.reshape(1, -1)


if __name__ == "__main__":
    out_dim = OUT_DIM
    gaussian_scale = 1.0

    key = jax.random.PRNGKey(0)
    k_x, k_B, k_W, k_b = jax.random.split(key, 4)

    # B_key == 'gaussian': B = randn(16) * gaussian_scale -> in_dim = out_dim = 32
    B = jax.random.normal(k_B, (PROJ,), dtype=jnp.float32) * gaussian_scale

    # nn.Linear(in_dim=32, out_dim=32): deterministic synthetic params.
    in_dim = out_dim
    bound = 1.0 / jnp.sqrt(in_dim)
    # W stored as (in_dim, out_dim) == fc.weight.T
    W = jax.random.uniform(k_W, (in_dim, out_dim), minval=-bound, maxval=bound,
                           dtype=jnp.float32)
    bias = jax.random.uniform(k_b, (out_dim,), minval=-bound, maxval=bound,
                              dtype=jnp.float32)

    # Small spec-consistent batch, plus a ragged multi-tile batch to exercise
    # packing, padding and the pipelined/parallel grid path.
    for bs in (8, 2500):
        kx = jax.random.fold_in(k_x, bs)
        x = jax.random.uniform(kx, (bs, 1), dtype=jnp.float32)
        out = jax.block_until_ready(latency_encoder(x, B, W, bias))
        ref = reference(x, B, W, bias)
        assert out.shape == (bs, out_dim)
        assert jnp.allclose(out, ref, atol=1e-5, rtol=1e-5), f"mismatch vs reference (bs={bs})"

    print("KERNEL_OK")
</pallas_src>

<mosaic_0001>
module attributes {stable_mosaic.version = 11 : i64} {
  func.func @latency_encoder_kernel(%arg0: i32, %arg1: memref<8x128xf32, #tpu.memory_space<vmem>>, %arg2: memref<1x128xf32, #tpu.memory_space<vmem>>, %arg3: memref<128x256xf32, #tpu.memory_space<vmem>>, %arg4: memref<128x256xf32, #tpu.memory_space<vmem>>, %arg5: memref<1x256xf32, #tpu.memory_space<vmem>>, %arg6: memref<8x256xf32, #tpu.memory_space<vmem>>) attributes {dimension_semantics = [#tpu.dimension_semantics<parallel>], iteration_bounds = array<i64: 1>, scalar_prefetch = 0 : i64, scratch_operands = 0 : i64, tpu.core_type = #tpu.core_type<tc>, window_params = [{transform_indices = @transform_0, window_bounds = array<i64: 8, 128>}, {pipeline_mode = #tpu.pipeline_mode<synchronous>, transform_indices = @transform_1, window_bounds = array<i64: 1, 128>}, {pipeline_mode = #tpu.pipeline_mode<synchronous>, transform_indices = @transform_2, window_bounds = array<i64: 128, 256>}, {pipeline_mode = #tpu.pipeline_mode<synchronous>, transform_indices = @transform_3, window_bounds = array<i64: 128, 256>}, {pipeline_mode = #tpu.pipeline_mode<synchronous>, transform_indices = @transform_4, window_bounds = array<i64: 1, 256>}, {transform_indices = @transform_5, window_bounds = array<i64: 8, 256>}]} {
    %c0 = arith.constant 0 : index
    %c0_0 = arith.constant 0 : index
    %0 = vector.load %arg1[%c0, %c0_0] : memref<8x128xf32, #tpu.memory_space<vmem>>, vector<8x128xf32>
    %c0_1 = arith.constant 0 : index
    %c0_2 = arith.constant 0 : index
    %1 = vector.load %arg2[%c0_1, %c0_2] : memref<1x128xf32, #tpu.memory_space<vmem>>, vector<1x128xf32>
    %2 = vector.broadcast %1 : vector<1x128xf32> to vector<8x128xf32>
    %3 = arith.mulf %0, %2 : vector<8x128xf32>
    %4 = math.sin %3 : vector<8x128xf32>
    %5 = math.cos %3 : vector<8x128xf32>
    %c0_3 = arith.constant 0 : index
    %c0_4 = arith.constant 0 : index
    %6 = vector.load %arg3[%c0_3, %c0_4] : memref<128x256xf32, #tpu.memory_space<vmem>>, vector<128x256xf32>
    %cst = arith.constant dense<0.000000e+00> : vector<8x256xf32>
    %7 = tpu.matmul %4, %6, %cst {dimension_numbers = #tpu.dot_dimension_numbers<[1], [0], [0], [1], [0, 0, 1, 1], [], []>} : vector<8x128xf32>, vector<128x256xf32>, vector<8x256xf32> -> vector<8x256xf32>
    %c0_5 = arith.constant 0 : index
    %c0_6 = arith.constant 0 : index
    %8 = vector.load %arg4[%c0_5, %c0_6] : memref<128x256xf32, #tpu.memory_space<vmem>>, vector<128x256xf32>
    %cst_7 = arith.constant dense<0.000000e+00> : vector<8x256xf32>
    %9 = tpu.matmul %5, %8, %cst_7 {dimension_numbers = #tpu.dot_dimension_numbers<[1], [0], [0], [1], [0, 0, 1, 1], [], []>} : vector<8x128xf32>, vector<128x256xf32>, vector<8x256xf32> -> vector<8x256xf32>
    %10 = arith.addf %7, %9 : vector<8x256xf32>
    %c0_8 = arith.constant 0 : index
    %c0_9 = arith.constant 0 : index
    %11 = vector.load %arg5[%c0_8, %c0_9] : memref<1x256xf32, #tpu.memory_space<vmem>>, vector<1x256xf32>
    %12 = vector.broadcast %11 : vector<1x256xf32> to vector<8x256xf32>
    %13 = arith.addf %10, %12 : vector<8x256xf32>
    %c0_10 = arith.constant 0 : index
    %c0_11 = arith.constant 0 : index
    %14 = vector.load %arg6[%c0_10, %c0_11] : memref<8x256xf32, #tpu.memory_space<vmem>>, vector<8x256xf32>
    tpu.vector_store %arg6[%c0_10, %c0_11], %13 {strides = array<i32>} : memref<8x256xf32, #tpu.memory_space<vmem>>, vector<8x256xf32>,
    return
  }
  func.func @transform_0(%arg0: i32) -> (i32, i32) {
    %c0_i32 = arith.constant 0 : i32
    %c0_i32_0 = arith.constant 0 : i32
    return %arg0, %c0_i32 : i32, i32
  }
  func.func @transform_1(%arg0: i32) -> (i32, i32) {
    %c0_i32 = arith.constant 0 : i32
    %c0_i32_0 = arith.constant 0 : i32
    %c0_i32_1 = arith.constant 0 : i32
    return %c0_i32, %c0_i32_0 : i32, i32
  }
  func.func @transform_2(%arg0: i32) -> (i32, i32) {
    %c0_i32 = arith.constant 0 : i32
    %c0_i32_0 = arith.constant 0 : i32
    %c0_i32_1 = arith.constant 0 : i32
    return %c0_i32, %c0_i32_0 : i32, i32
  }
  func.func @transform_3(%arg0: i32) -> (i32, i32) {
    %c0_i32 = arith.constant 0 : i32
    %c0_i32_0 = arith.constant 0 : i32
    %c0_i32_1 = arith.constant 0 : i32
    return %c0_i32, %c0_i32_0 : i32, i32
  }
  func.func @transform_4(%arg0: i32) -> (i32, i32) {
    %c0_i32 = arith.constant 0 : i32
    %c0_i32_0 = arith.constant 0 : i32
    %c0_i32_1 = arith.constant 0 : i32
    return %c0_i32, %c0_i32_0 : i32, i32
  }
  func.func @transform_5(%arg0: i32) -> (i32, i32) {
    %c0_i32 = arith.constant 0 : i32
    %c0_i32_0 = arith.constant 0 : i32
    return %arg0, %c0_i32 : i32, i32
  }
}

</mosaic_0001>

<bundles_post_ra>
// kernel: tpu_custom_call.1
= control target key start
LH: loop header
LB: loop body
LE: loop exit
PB: predicated region body
PF: predicated region fallthrough
CT: control target
= control target key end

     0   :  { %10 = vsyncpa [#allocation3], 0  ;;  %s825_s0 = inlined_call_operand.hbm [shape: f32[8,128], index: 0, kind: input, shape index: {}]   ;;  %s826_s1 = inlined_call_operand.hbm [shape: f32[1,128], index: 1, kind: input, shape index: {}]   ;;  %s827_s2 = inlined_call_operand.hbm [shape: f32[128,256], index: 2, kind: input, shape index: {}]   ;;  %s828_s3 = inlined_call_operand.hbm [shape: f32[128,256], index: 3, kind: input, shape index: {}]   ;;  %s829_s4 = inlined_call_operand.vmem [shape: f32[1,256], index: 4, kind: input, shape index: {}]   ;;  %s830_s5 = inlined_call_operand.hbm [shape: f32[8,256], index: 5, kind: output, shape index: {}]  }
   0x1   :  { %11 = vsyncpa [#allocation6], 0 }
   0x2   :  { %12 = vsyncpa [#allocation9], 0  ;;  %s30_s20 = sshll.u32 %s826_s1, 4  ;;  %s31_s20 = int_to_ptr.hbm [resolvable:$true] %s30_s20 }
   0x3   :  { %13 = vsyncpa [#allocation4], 0  ;;  %s717_s21 = smov [#allocation5]   ;;  %s19_s25 = sshll.u32 %s825_s0, 4  ;;  %s20_s25 = int_to_ptr.hbm [resolvable:$true] %s19_s25 }
   0x4   :  { %s32_s22 = sshll.u32 %s717_s21, 4  ;;  %s718_s26 = smov [#allocation2]   ;;  %s33_s22 = int_to_ptr.vmem [resolvable:$true] %s32_s22 }
   0x5   :  { %35 = dma.hbm_to_vmem [thread:$0]  %s31_s20, 16, %s33_s22, [#allocation6]  }
   0x6   :  { %s21_s27 = sshll.u32 %s718_s26, 4  ;;  %s40_s30 = sshll.u32 %s827_s2, 4  ;;  %s22_s27 = int_to_ptr.vmem [resolvable:$true] %s21_s27  ;;  %s41_s30 = int_to_ptr.hbm [resolvable:$true] %s40_s30 }
   0x7   :  { %24 = dma.hbm_to_vmem [thread:$0]  %s20_s25, 128, %s22_s27, [#allocation3]  }
   0x8   :  { %s719_s1 = smov [#allocation7]   ;;  %s53_s9 = sshll.u32 %s828_s3, 4  ;;  %s54_s9 = int_to_ptr.hbm [resolvable:$true] %s53_s9 }
   0x9   :  { %s42_s6 = sshll.u32 %s719_s1, 4  ;;  %s720_s10 = smov 256   ;;  %s43_s6 = int_to_ptr.vmem [resolvable:$true] %s42_s6 }
   0xa   :  { %s721_s0 = smov 16   ;;  %s722_s11 = smov [#allocation8]  }
   0xb   :  { %48 = dma.hbm_to_vmem [thread:$0]  %s41_s30, 4096, %s43_s6, [#allocation6], %s720_s10, %s720_s10, %s721_s0  }
   0xc   :  { %s55_s12 = sshll.u32 %s722_s11, 4  ;;  %s56_s12 = int_to_ptr.vmem [resolvable:$true] %s55_s12 }
   0xd   :  { %61 = dma.hbm_to_vmem [thread:$0]  %s54_s9, 4096, %s56_s12, [#allocation9], %s720_s10, %s720_s10, %s721_s0  }
   0xe   :  { %709 = dma.done.wait [#allocation3], 128  }
   0xf   :  { %710 = vsyncadd [#allocation3], 4294967168 }
  0x10   :  { %711 = dma.done.wait [#allocation6], 4112  }
  0x11   :  { %712 = vsyncadd [#allocation6], 4294963184 }
  0x12   :  { %713 = dma.done.wait [#allocation9], 4096  }
  0x13   :  { %714 = vsyncadd [#allocation9], 4294963200  ;;  %v425_v0 = vld [vmem:[#allocation7 + $0xf0] sm:$0xff]  ;;  %v426_v1 = vld [vmem:[#allocation7 + $0xf8] sm:$0xff]  ;;  %s730_s13 = smov [#allocation10]   ;;  %s556_s17 = sshll.u32 %s830_s5, 4  ;;  %s557_s17 = int_to_ptr.hbm [resolvable:$true] %s556_s17 }
  0x14   :  { %v423_v2 = vld [vmem:[#allocation7 + $0xe0] sm:$0xff]  ;;  %499 = vmatpush.msra.mxu2 %v425_v0  ;;  %519 = vmatpush.msra.mxu3 %v426_v1  ;;  %v424_v3 = vld [vmem:[#allocation7 + $0xe8] sm:$0xff]  ;;  %v421_v4 = vld [vmem:[#allocation7 + $0xd0] sm:$0xff]  ;;  %s554_s14 = sshll.u32 %s730_s13, 4  ;;  %s555_s14 = int_to_ptr.vmem [resolvable:$true] %s554_s14 }
  0x15   :  { %v422_v5 = vld [vmem:[#allocation7 + $0xd8] sm:$0xff]  ;;  %v457_v6 = vld [vmem:[#allocation8 + $0xf0] sm:$0xff]  ;;  %v455_v8 = vld [vmem:[#allocation8 + $0xe0] sm:$0xff] }
  0x16   :  { %v458_v7 = vld [vmem:[#allocation8 + $0xf8] sm:$0xff]  ;;  %500 = vmatpush.msra.mxu2 %v423_v2  ;;  %520 = vmatpush.msra.mxu3 %v424_v3  ;;  %v456_v9 = vld [vmem:[#allocation8 + $0xe8] sm:$0xff]  ;;  %v419_v10 = vld [vmem:[#allocation7 + $0xc0] sm:$0xff] }
  0x17   :  { %459 = vmatpush.msra.mxu0 %v457_v6  ;;  %479 = vmatpush.msra.mxu1 %v458_v7  ;;  %v420_v11 = vld [vmem:[#allocation7 + $0xc8] sm:$0xff]  ;;  %v453_v12 = vld [vmem:[#allocation8 + $0xd0] sm:$0xff]  ;;  %v454_v13 = vld [vmem:[#allocation8 + $0xd8] sm:$0xff] }
  0x18   :  { %501 = vmatpush.msra.mxu2 %v421_v4  ;;  %521 = vmatpush.msra.mxu3 %v422_v5  ;;  %v417_v14 = vld [vmem:[#allocation7 + $0xb0] sm:$0xff]  ;;  %v418_v15 = vld [vmem:[#allocation7 + $0xb8] sm:$0xff]  ;;  %v451_v16 = vld [vmem:[#allocation8 + $0xc0] sm:$0xff] }
  0x19   :  { %460 = vmatpush.msra.mxu0 %v455_v8  ;;  %480 = vmatpush.msra.mxu1 %v456_v9  ;;  %v452_v17 = vld [vmem:[#allocation8 + $0xc8] sm:$0xff]  ;;  %v415_v18 = vld [vmem:[#allocation7 + $0xa0] sm:$0xff]  ;;  %v449_v20 = vld [vmem:[#allocation8 + $0xb0] sm:$0xff]  ;;  %v723_v8 = vmov 683565275  }
  0x1a   :  { %502 = vmatpush.msra.mxu2 %v419_v10  ;;  %522 = vmatpush.msra.mxu3 %v420_v11  ;;  %v416_v19 = vld [vmem:[#allocation7 + $0xa8] sm:$0xff]  ;;  %v450_v21 = vld [vmem:[#allocation8 + $0xb8] sm:$0xff]  ;;  %v413_v22 = vld [vmem:[#allocation7 + $0x90] sm:$0xff]  ;;  %v724_v10 = vmov 2475754826  }
  0x1b   :  { %461 = vmatpush.msra.mxu0 %v453_v12  ;;  %481 = vmatpush.msra.mxu1 %v454_v13  ;;  %v414_v23 = vld [vmem:[#allocation7 + $0x98] sm:$0xff]  ;;  %v447_v24 = vld [vmem:[#allocation8 + $0xa0] sm:$0xff]  ;;  %v448_v25 = vld [vmem:[#allocation8 + $0xa8] sm:$0xff]  ;;  %v725_v12 = vmov 2131351028  }
  0x1c   :  { %503 = vmatpush.msra.mxu2 %v417_v14  ;;  %523 = vmatpush.msra.mxu3 %v418_v15  ;;  %v411_v26 = vld [vmem:[#allocation7 + $0x80] sm:$0xff]  ;;  %v412_v27 = vld [vmem:[#allocation7 + $0x88] sm:$0xff]  ;;  %v445_v28 = vld [vmem:[#allocation8 + $0x90] sm:$0xff]  ;;  %v726_v14 = vmov 2102212464  }
  0x1d   :  { %462 = vmatpush.msra.mxu0 %v451_v16  ;;  %482 = vmatpush.msra.mxu1 %v452_v17  ;;  %v446_v29 = vld [vmem:[#allocation8 + $0x98] sm:$0xff]  ;;  %v409_v30 = vld [vmem:[#allocation7 + $0x70] sm:$0xff]  ;;  %v443_v32 = vld [vmem:[#allocation8 + $0x80] sm:$0xff]  ;;  %v727_v16 = vmov 920167782  }
  0x1e   :  { %504 = vmatpush.msra.mxu2 %v415_v18  ;;  %524 = vmatpush.msra.mxu3 %v416_v19  ;;  %v410_v31 = vld [vmem:[#allocation7 + $0x78] sm:$0xff]  ;;  %v444_v33 = vld [vmem:[#allocation8 + $0x88] sm:$0xff]  ;;  %v407_v34 = vld [vmem:[#allocation7 + $0x60] sm:$0xff] }
  0x1f   :  { %463 = vmatpush.msra.mxu0 %v449_v20  ;;  %483 = vmatpush.msra.mxu1 %v450_v21  ;;  %v408_v35 = vld [vmem:[#allocation7 + $0x68] sm:$0xff]  ;;  %v441_v36 = vld [vmem:[#allocation8 + $0x70] sm:$0xff]  ;;  %v442_v37 = vld [vmem:[#allocation8 + $0x78] sm:$0xff] }
  0x20   :  { %505 = vmatpush.msra.mxu2 %v413_v22  ;;  %525 = vmatpush.msra.mxu3 %v414_v23  ;;  %v405_v38 = vld [vmem:[#allocation7 + $0x50] sm:$0xff]  ;;  %v406_v39 = vld [vmem:[#allocation7 + $0x58] sm:$0xff]  ;;  %v439_v40 = vld [vmem:[#allocation8 + $0x60] sm:$0xff]  ;;  %v728_v22 = vmov 1326507024  }
  0x21   :  { %464 = vmatpush.msra.mxu0 %v447_v24  ;;  %484 = vmatpush.msra.mxu1 %v448_v25  ;;  %v440_v41 = vld [vmem:[#allocation8 + $0x68] sm:$0xff]  ;;  %v80_v42 = vld [vmem:[#allocation2] sm:$0xff]  ;;  %v403_v43 = vld [vmem:[#allocation7 + $0x40] sm:$0xff] }
  0x22   :  { %506 = vmatpush.msra.mxu2 %v411_v26  ;;  %526 = vmatpush.msra.mxu3 %v412_v27  ;;  %v404_v44 = vld [vmem:[#allocation7 + $0x48] sm:$0xff]  ;;  %v588_v45 = vld [vmem:[#allocation5] ss:$0 sm:$0xff]  ;;  %v437_v46 = vld [vmem:[#allocation8 + $0x50] sm:$0xff] }
  0x23   :  { %465 = vmatpush.msra.mxu0 %v445_v28  ;;  %485 = vmatpush.msra.mxu1 %v446_v29  ;;  %v438_v47 = vld [vmem:[#allocation8 + $0x58] sm:$0xff]  ;;  %v401_v48 = vld [vmem:[#allocation7 + $0x30] sm:$0xff]  ;;  %v773_v50 = vmul.f32 %v588_v45, %v80_v42  ;;  %v435_v51 = vld [vmem:[#allocation8 + $0x40] sm:$0xff] }
  0x24   :  { %507 = vmatpush.msra.mxu2 %v409_v30  ;;  %527 = vmatpush.msra.mxu3 %v410_v31  ;;  %v402_v49 = vld [vmem:[#allocation7 + $0x38] sm:$0xff]  ;;  %v436_v52 = vld [vmem:[#allocation8 + $0x48] sm:$0xff]  ;;  %v399_v53 = vld [vmem:[#allocation7 + $0x20] sm:$0xff] }
  0x25   :  { %466 = vmatpush.msra.mxu0 %v443_v32  ;;  %486 = vmatpush.msra.mxu1 %v444_v33  ;;  %v400_v54 = vld [vmem:[#allocation7 + $0x28] sm:$0xff]  ;;  %v89_v55 = vand.u32 2139095040, %v773_v50  ;;  %v433_v56 = vld [vmem:[#allocation8 + $0x30] sm:$0xff]  ;;  %v434_v57 = vld [vmem:[#allocation8 + $0x38] sm:$0xff]  ;;  %v86_v61 = vand.u32 2147483647, %v773_v50 }
  0x26   :  { %508 = vmatpush.msra.mxu2 %v407_v34  ;;  %528 = vmatpush.msra.mxu3 %v408_v35  ;;  %v397_v58 = vld [vmem:[#allocation7 + $0x10] sm:$0xff]  ;;  %v398_v59 = vld [vmem:[#allocation7 + $0x18] sm:$0xff]  ;;  %v395_v62 = vld [vmem:[#allocation7] sm:$0xff]  ;;  %vm88_vm12 = vcmp.lt.s32.totalorder %v773_v50, 0 }
  0x27   :  { %467 = vmatpush.msra.mxu0 %v441_v36  ;;  %487 = vmatpush.msra.mxu1 %v442_v37  ;;  %v90_v60 = vshrl.u32 %v89_v55, 23  ;;  %v396_v63 = vld [vmem:[#allocation7 + $0x8] sm:$0xff]  ;;  %v93_v2 = vand.u32 8388607, %v86_v61  ;;  %vm87_vm13 = vcmp.le.f32.partialorder %v86_v61, 0.7853982 }
  0x28   :  { %509 = vmatpush.msra.mxu2 %v405_v38  ;;  %529 = vmatpush.msra.mxu3 %v406_v39 }
  0x29   :  { %468 = vmatpush.msra.mxu0 %v439_v40  ;;  %488 = vmatpush.msra.mxu1 %v440_v41  ;;  %v568_v0 = vadd.s32 4294967169, %v90_v60  ;;  %v94_v5 = vor.u32 8388608, %v93_v2 }
  0x2a   :  { %510 = vmatpush.msra.mxu2 %v403_v43  ;;  %530 = vmatpush.msra.mxu3 %v404_v44 }
  0x2b   :  { %469 = vmatpush.msra.mxu0 %v437_v46  ;;  %489 = vmatpush.msra.mxu1 %v438_v47  ;;  %v96_v1 = vadd.s32 1, %v568_v0  ;;  %v782_v24 = vshll.u32 %v94_v5, 8 }
  0x2c   :  { %511 = vmatpush.msra.mxu2 %v401_v48  ;;  %531 = vmatpush.msra.mxu3 %v402_v49 }
  0x2d   :  { %470 = vmatpush.msra.mxu0 %v435_v51  ;;  %490 = vmatpush.msra.mxu1 %v436_v52  ;;  %vm97_vm0 = vcmp.gt.s32.totalorder %v96_v1, 0  ;;  %v135_v36 = vand.u32 65535, %v782_v24  ;;  %v136_v37 = vshrl.u32 %v782_v24, 16 }
  0x2e   :  { %512 = vmatpush.msra.mxu2 %v399_v53  ;;  %532 = vmatpush.msra.mxu3 %v400_v54  ;;  %v98_v3 = vsel %vm97_vm0, %v96_v1, 0 }
  0x2f   :  { %471 = vmatpush.msra.mxu0 %v433_v56  ;;  %491 = vmatpush.msra.mxu1 %v434_v57  ;;  %v100_v4 = vand.u32 31, %v98_v3  ;;  %v779_v6 = vshrl.u32 %v98_v3, 5 }
  0x30   :  { %513 = vmatpush.msra.mxu2 %v397_v58  ;;  %533 = vmatpush.msra.mxu3 %v398_v59 }
  0x31   :  { %v101_v7 = vsub.s32 32, %v100_v4  ;;  %v103_v9 = vshll.u32 %v723_v8, %v100_v4  ;;  %v106_v11 = vshll.u32 %v724_v10, %v100_v4  ;;  %v109_v13 = vshll.u32 %v725_v12, %v100_v4 }
  0x32   :  { %514 = vmatpush.msra.mxu2 %v395_v62  ;;  %534 = vmatpush.msra.mxu3 %v396_v63  ;;  %v112_v15 = vshll.u32 %v726_v14, %v100_v4  ;;  %v115_v17 = vshll.u32 %v727_v16, %v100_v4  ;;  %vm118_vm1 = vcmp.lt.s32.totalorder %v779_v6, 1  ;;  %vm121_vm2 = vcmp.lt.s32.totalorder %v779_v6, 4 }
  0x33   :  { %v104_v18 = vshrl.u32 %v724_v10, %v101_v7  ;;  %v107_v19 = vshrl.u32 %v725_v12, %v101_v7  ;;  %v110_v20 = vshrl.u32 %v726_v14, %v101_v7  ;;  %v113_v21 = vshrl.u32 %v727_v16, %v101_v7 }
  0x34   :  { %v116_v23 = vshrl.u32 %v728_v22, %v101_v7  ;;  %vm120_vm3 = vcmp.lt.s32.totalorder %v779_v6, 3  ;;  %vm119_vm4 = vcmp.lt.s32.totalorder %v779_v6, 2  ;;  %v102_v44 = vshrl.u32 %v723_v8, %v101_v7 }
  0x35   :  { %v105_v25 = vor.u32 %v104_v18, %v103_v9  ;;  %v108_v26 = vor.u32 %v107_v19, %v106_v11  ;;  %v111_v27 = vor.u32 %v110_v20, %v109_v13  ;;  %v114_v28 = vor.u32 %v113_v21, %v112_v15 }
  0x36   :  { %v117_v29 = vor.u32 %v116_v23, %v115_v17  ;;  %v729_v62 = vmov 0  }
  0x37   :  { %v126_v30 = vsel %vm118_vm1, %v105_v25, %v108_v26  ;;  %v130_v31 = vsel %vm118_vm1, %v108_v26, %v111_v27  ;;  %v127_v32 = vsel %vm121_vm2, %v114_v28, 920167782  ;;  %v122_v58 = vsel %vm118_vm1, %v102_v44, %v105_v25 }
  0x38   :  { %v131_v33 = vsel %vm121_vm2, %v117_v29, 1326507024  ;;  %v128_v34 = vsel %vm120_vm3, %v111_v27, %v127_v32  ;;  %v123_v60 = vsel %vm121_vm2, %v111_v27, 2102212464 }
  0x39   :  { %v132_v35 = vsel %vm120_vm3, %v114_v28, %v131_v33  ;;  %v129_v38 = vsel %vm119_vm4, %v126_v30, %v128_v34  ;;  %v124_v8 = vsel %vm120_vm3, %v108_v26, %v123_v60 }
  0x3a   :  { %v133_v39 = vsel %vm119_vm4, %v130_v31, %v132_v35  ;;  %v159_v42 = vand.u32 65535, %v129_v38  ;;  %v160_v43 = vshrl.u32 %v129_v38, 16  ;;  %v125_v16 = vsel %vm119_vm4, %v122_v58, %v124_v8 }
  0x3b   :  { %v137_v40 = vand.u32 65535, %v133_v39  ;;  %v138_v41 = vshrl.u32 %v133_v39, 16  ;;  %v179_v20 = vmul.u32 %v782_v24, %v125_v16  ;;  %vm229_vm4 = vweird.f32 %v773_v50 }
  0x3c   :  { %v161_v48 = vmul.u32 %v159_v42, %v135_v36  ;;  %v162_v49 = vmul.u32 %v160_v43, %v135_v36  ;;  %v163_v51 = vmul.u32 %v159_v42, %v136_v37  ;;  %v164_v55 = vmul.u32 %v160_v43, %v136_v37  ;;  %v429_v42 = vld [vmem:[#allocation8 + $0x10] sm:$0xff] }
  0x3d   :  { %v139_v45 = vmul.u32 %v137_v40, %v135_v36  ;;  %v140_v46 = vmul.u32 %v138_v41, %v135_v36  ;;  %v141_v47 = vmul.u32 %v137_v40, %v136_v37  ;;  %v142_v52 = vmul.u32 %v138_v41, %v136_v37  ;;  %v431_v40 = vld [vmem:[#allocation8 + $0x20] sm:$0xff]  ;;  %v432_v41 = vld [vmem:[#allocation8 + $0x28] sm:$0xff] }
  0x3e   :  { %v165_v56 = vshll.u32 %v162_v49, 16  ;;  %v167_v57 = vshll.u32 %v163_v51, 16  ;;  %v166_v5 = vshrl.u32 %v162_v49, 16  ;;  %v168_v12 = vshrl.u32 %v163_v51, 16  ;;  %472 = vmatpush.msra.mxu0 %v431_v40  ;;  %492 = vmatpush.msra.mxu1 %v432_v41 }
  0x3f   :  { %v143_v53 = vshll.u32 %v140_v46, 16  ;;  %v145_v54 = vshll.u32 %v141_v47, 16  ;;  %v144_v1 = vshrl.u32 %v140_v46, 16  ;;  %v146_v9 = vshrl.u32 %v141_v47, 16  ;;  %v427_v46 = vld [vmem:[#allocation8] sm:$0xff]  ;;  %v428_v47 = vld [vmem:[#allocation8 + $0x8] sm:$0xff] }
  0x40   :  { %vm169_vm6 = vc.u32 %v161_v48, %v165_v56  ;;  %v171_v0 = vadd.s32 %v165_v56, %v161_v48  ;;  %473 = vmatpush.msra.mxu0 %v429_v42 }
  0x41   :  { %vm147_vm5 = vc.u32 %v139_v45, %v143_v53  ;;  %v149_v59 = vadd.s32 %v143_v53, %v139_v45  ;;  %v170_v3 = vsel %vm169_vm6, 1, %v729_v62  ;;  %v430_v45 = vld [vmem:[#allocation8 + $0x18] sm:$0xff] }
  0x42   :  { %v148_v63 = vsel %vm147_vm5, 1, %v729_v62  ;;  %v172_v7 = vadd.s32 %v170_v3, %v164_v55  ;;  %vm173_vm8 = vc.u32 %v171_v0, %v167_v57  ;;  %v175_v15 = vadd.s32 %v171_v0, %v167_v57  ;;  %493 = vmatpush.msra.mxu1 %v430_v45  ;;  %474 = vmatpush.msra.mxu0 %v427_v46 }
  0x43   :  { %v150_v2 = vadd.s32 %v148_v63, %v142_v52  ;;  %vm151_vm7 = vc.u32 %v149_v59, %v145_v54  ;;  %v174_v11 = vsel %vm173_vm8, 1, %v729_v62 }
  0x44   :  { %v152_v4 = vsel %vm151_vm7, 1, %v729_v62  ;;  %v176_v13 = vadd.s32 %v174_v11, %v172_v7  ;;  %494 = vmatpush.msra.mxu1 %v428_v47 }
  0x45   :  { %v154_v10 = vadd.s32 %v152_v4, %v150_v2 }
  0x46   :  { %v177_v17 = vadd.s32 %v176_v13, %v166_v5 }
  0x47   :  { %v155_v14 = vadd.s32 %v154_v10, %v144_v1 }
  0x48   :  { %v178_v19 = vadd.s32 %v177_v17, %v168_v12 }
  0x49   :  { %v156_v18 = vadd.s32 %v155_v14, %v146_v9 }
  0x4a   :  { %v182_v21 = vadd.s32 1, %v178_v19 }
  0x4b   :  { %vm181_vm9 = vc.u32 %v156_v18, %v175_v15  ;;  %v180_v6 = vadd.s32 %v175_v15, %v156_v18 }
  0x4c   :  { %v183_v22 = vsel %vm181_vm9, %v182_v21, %v178_v19  ;;  %v539_v21 = vld [vmem:[%s829_s4] sm:$0x3] }
  0x4d   :  { %v184_v23 = vadd.s32 %v183_v22, %v179_v20 }
  0x4f   :  { %v185_v25 = vadd.s32 536870912, %v184_v23 }
  0x51   :  { %v186_v26 = vshrl.u32 %v185_v25, 30  ;;  %v541_v25 = vperm.slane %v539_v21, 0 }
  0x53   :  { %v187_v27 = vshll.u32 %v186_v26, 30  ;;  %v210_v51 = vsub.s32 4, %v186_v26 }
  0x55   :  { %v188_v28 = vsub.s32 %v184_v23, %v187_v27  ;;  %v211_v54 = vsel %vm88_vm12, %v210_v51, %v186_v26  ;;  %v542_v26 = vperm.slane %v539_v21, 1 }
  0x56   :  { %v213_v57 = vsel %vm87_vm13, 0, %v211_v54 }
  0x57   :  { %vm189_vm10 = vcmp.lt.s32.totalorder %v188_v28, 0  ;;  %v190_v29 = vsub.s32 0, %v188_v28  ;;  %v230_v63 = vadd.s32 3, %v213_v57  ;;  %v385_v5 = vand.u32 3, %v213_v57 }
  0x59   :  { %v191_v30 = vsel %vm189_vm10, %v190_v29, %v188_v28  ;;  %v231_v4 = vand.u32 3, %v230_v63  ;;  %vm390_vm15 = vcmp.eq.s32.totalorder %v385_v5, 2  ;;  %vm387_vm2 = vcmp.eq.s32.totalorder %v385_v5, 0 }
  0x5a   :  { %v192_v31 = vclz %v191_v30  ;;  %vm386_vm3 = vcmp.lt.s32.totalorder %v385_v5, 2 }
  0x5b   :  { %vm236_vm14 = vcmp.eq.s32.totalorder %v231_v4, 2  ;;  %vm232_vm0 = vcmp.lt.s32.totalorder %v231_v4, 2  ;;  %vm233_vm1 = vcmp.eq.s32.totalorder %v231_v4, 0 }
  0x5c   :  { %v569_v32 = vadd.s32 4294967294, %v192_v31 }
  0x5e   :  { %vm570_vm11 = vcmp.lt.s32.totalorder %v569_v32, 0 }
  0x5f   :  { %v195_v33 = vsel %vm570_vm11, 0, %v569_v32 }
  0x60   :  { %v196_v34 = vsub.s32 32, %v195_v33  ;;  %v197_v35 = vshll.u32 %v188_v28, %v195_v33  ;;  %v200_v36 = vsub.s32 4294967266, %v195_v33 }
  0x62   :  { %v198_v24 = vshrl.u32 %v180_v6, %v196_v34  ;;  %v201_v37 = vadd.s32 127, %v200_v36 }
  0x64   :  { %v199_v38 = vor.u32 %v198_v24, %v197_v35  ;;  %v202_v39 = vshll.u32 %v201_v37, 23 }
  0x66   :  { %v203_v43 = vor.u32 4788187, %v202_v39  ;;  %v206_v44 = vcvt.s32.f32 %v199_v38 }
  0x68   :  { %v204_v48 = vand.u32 2147483647, %v203_v43 }
  0x6a   :  { %v207_v49 = vmul.f32 %v206_v44, %v204_v48 }
  0x6c   :  { %v208_v52 = vxor.u32 2147483648, %v207_v49 }
  0x6e   :  { %v209_v53 = vsel %vm88_vm12, %v208_v52, %v207_v49 }
  0x6f   :  { %v212_v55 = vsel %vm87_vm13, %v773_v50, %v209_v53 }
  0x70   :  { %v214_v56 = vmul.f32 %v212_v55, %v212_v55 }
  0x72   :  { %v215_v58 = vmul.f32 -0.001358992, %v214_v56  ;;  %v222_v59 = vmul.f32 -0.00019511016, %v214_v56 }
  0x74   :  { %v216_v60 = vadd.f32 0.041655596, %v215_v58  ;;  %v223_v62 = vadd.f32 0.008332121, %v222_v59 }
  0x76   :  { %v217_v0 = vmul.f32 %v216_v60, %v214_v56  ;;  %v224_v1 = vmul.f32 %v223_v62, %v214_v56 }
  0x78   :  { %v218_v2 = vadd.f32 -0.4999988, %v217_v0  ;;  %v225_v3 = vadd.f32 -0.16666654, %v224_v1 }
  0x7a   :  { %v219_v7 = vmul.f32 %v218_v2, %v214_v56  ;;  %v226_v61 = vmul.f32 %v225_v3, %v214_v56 }
  0x7c   :  { %v220_v8 = vadd.f32 1.0, %v219_v7  ;;  %v227_v9 = vadd.f32 1.0, %v226_v61 }
  0x7e   :  { %v228_v10 = vmul.f32 %v227_v9, %v212_v55  ;;  %v237_v11 = vxor.u32 2147483648, %v220_v8 }
  0x80   :  { %v234_v12 = vxor.u32 2147483648, %v228_v10  ;;  %v238_v13 = vsel %vm236_vm14, %v237_v11, %v228_v10  ;;  %v392_v14 = vsel %vm390_vm15, %v237_v11, %v228_v10 }
  0x82   :  { %v235_v15 = vsel %vm233_vm1, %v220_v8, %v234_v12  ;;  %v389_v16 = vsel %vm387_vm2, %v220_v8, %v234_v12 }
  0x83   :  { %v239_v17 = vsel %vm232_vm0, %v235_v15, %v238_v13  ;;  %v393_v18 = vsel %vm386_vm3, %v389_v16, %v392_v14 }
  0x84   :  { %v240_v19 = vsel %vm229_vm4, nan, %v239_v17  ;;  %v394_v20 = vsel %vm229_vm4, nan, %v393_v18 }
  0x85   :  { %515 = vmatmul.f32.vlgmr.msra.gmra.mxu2 %v240_v19  ;;  %535 = vmatmul.f32.vlgmr.msra.gmra.mxu3 %v240_v19 }
  0x86   :  { %475 = vmatmul.f32.vlgmr.msra.gmra.mxu0 %v394_v20  ;;  %495 = vmatmul.f32.vlgmr.msra.gmra.mxu1 %v394_v20 }
 0x103   :  { %v476_v22 = vpop.f32.mrf.mxu0  ;;  %v496_v23 = vpop.f32.mrf.mxu1 }
 0x108   :  { %v516_v27 = vpop.f32.mrf.mxu2  ;;  %v536_v50 = vpop.f32.mrf.mxu3 }
 0x109   :  { %v517_v28 = vadd.f32 %v516_v27, %v476_v22  ;;  %v537_v29 = vadd.f32 %v536_v50, %v496_v23 }
 0x10b   :  { %v545_v30 = vadd.f32 %v541_v25, %v517_v28  ;;  %v546_v31 = vadd.f32 %v542_v26, %v537_v29 }
 0x10d   :  { %547 = vst [vmem:[#allocation10] sm:$0xff] %v545_v30 }
 0x10e   :  { %548 = vst [vmem:[#allocation10 + $0x8] sm:$0xff] %v546_v31 }
 0x10f   :  { %559 = dma.vmem_to_hbm [thread:$0]  %s555_s14, 256, %s557_s17, [#allocation4]  }
 0x110   :  { %715 = dma.done.wait [#allocation4], 256  }
 0x111   :  { %716 = vsyncadd [#allocation4], 4294967040 }
 0x112   :  { %564 = vsyncpa [#allocation3], 1 }
 0x113   :  { %565 = vsyncpa [#allocation6], 1 }
 0x114   :  { %566 = vsyncpa [#allocation9], 1 }
 0x115   :  { %567 = vsyncpa [#allocation4], 1 }

</bundles_post_ra>
